<compile_context>
chip_gen: v5e
topology: v5e:2x2
jax: 0.10.0
libtpu: 0.0.40
codegen_flags: <defaults>
</compile_context>

<pallas_src>
import functools

import jax
import jax.numpy as jnp
from jax.experimental import pallas as pl
from jax.experimental.pallas import tpu as pltpu

LN_EPS = 1e-5
HEAD_SCALE = 0.02


def _round_up(x, m):
    return (x + m - 1) // m * m


# ----------------------------- kernel ----------------------------------------


def c2f_critic_kernel(lvl_ref, obs_ref, enc_w_ref, m_enc_ref, w1h_ref, w1x_ref,
                      m_hid_ref, w2_ref, hw_ref, slab_ref, out_ref,
                      *, num_levels):
    cdt = enc_w_ref.dtype          # MXU operand dtype (f32 or bf16)
    B = obs_ref.shape[0]
    F4 = m_enc_ref.shape[0]        # 4 * feature_dim (fused encoder width)
    H2 = m_hid_ref.shape[0]        # 2 * hidden_dim (fused trunk width)
    out_w = out_ref.shape[1]

    def seg_layernorm(x, m_ref, g, b):
        # One stacked matmul gives per-segment E[x] and E[x^2] together
        # (rows [0:B] / [B:2B] of the result); var = E[x^2] - mu^2.
        m = m_ref[...]
        stacked = jnp.concatenate([x, x * x], axis=0).astype(m.dtype)
        stats = jnp.dot(stacked, m, preferred_element_type=jnp.float32)
        mu = stats[:B]
        var = stats[B:] - mu * mu
        return (x - mu) * jax.lax.rsqrt(var + LN_EPS) * g + b

    # Tiny affine/bias rows from the packed slab (static slices, lane offset 0).
    g_enc = slab_ref[0:1, 0:F4]
    b_enc = slab_ref[1:2, 0:F4]
    g1 = slab_ref[2:3, 0:H2]
    b1 = slab_ref[3:4, 0:H2]
    g2 = slab_ref[4:5, 0:H2]
    b2 = slab_ref[5:6, 0:H2]
    hb = slab_ref[6:7, 0:out_w]

    # Per-level pre-LN bias row (slab rows 7..7+levels-1), selected with an
    # unrolled where-select on the SMEM level scalar (levels is tiny).
    lvl = lvl_ref[0]
    lvl_bias = jnp.zeros((1, H2), jnp.float32)
    for l in range(num_levels):
        lvl_bias = jnp.where(lvl == l, slab_ref[7 + l:8 + l, 0:H2], lvl_bias)

    obs = obs_ref[...].astype(cdt)   # [rgb | low | prev_action | zero pad]

    # Fused rgb+low encoders for both branches: one matmul -> (B, 4F).
    h = jnp.dot(obs, enc_w_ref[...], preferred_element_type=jnp.float32)
    h = jnp.tanh(seg_layernorm(h, m_enc_ref, g_enc, b_enc))

    # Trunk layer 1: block-diagonal over branches + prev_action term (reusing
    # the fused obs input) + level bias added BEFORE the LayerNorm.
    z = (jnp.dot(h.astype(cdt), w1h_ref[...], preferred_element_type=jnp.float32)
         + jnp.dot(obs, w1x_ref[...], preferred_element_type=jnp.float32)
         + lvl_bias)
    z = seg_layernorm(z, m_hid_ref, g1, b1)
    z = z * jax.nn.sigmoid(z)        # SiLU (f32 on the VPU/EUP, v5e-safe)

    # Trunk layer 2 (block-diagonal).
    z = jnp.dot(z.astype(cdt), w2_ref[...], preferred_element_type=jnp.float32)
    z = seg_layernorm(z, m_hid_ref, g2, b2)
    z = z * jax.nn.sigmoid(z)

    # Head with the dueling combine folded into hw/hb; lane-dense unmasked store.
    out_ref[...] = (jnp.dot(z.astype(cdt), hw_ref[...],
                            preferred_element_type=jnp.float32) + hb)


# ----------------------------- one-time parameter prep -------------------------


def make_expand_matrix(actor_dim, bins, atoms):
    """E[(a,t), (a,b,t)] = 1 : broadcasts (A*atoms) -> (A*bins*atoms)."""
    j = jnp.arange(actor_dim * bins * atoms)
    i_of_j = (j // (bins * atoms)) * atoms + (j % atoms)
    e = (jnp.arange(actor_dim * atoms)[:, None] == i_of_j[None, :])
    return e.astype(jnp.float32)


def segment_mean_matrix(num_segments, seg_width):
    n = num_segments * seg_width
    seg = jnp.arange(n) // seg_width
    return (seg[:, None] == seg[None, :]).astype(jnp.float32) / seg_width


def prepare_params(params, cfg, matmul_dtype=jnp.float32):
    """Fuse/pad all weights once (hoisted out of the per-call forward path)."""
    A, bins, atoms = cfg["actor_dim"], cfg["bins"], cfg["atoms"]
    levels, F, H = cfg["levels"], cfg["feature_dim"], cfg["hidden_dim"]
    R, L = cfg["repr_dim"], cfg["low_dim"]
    pv, pa = params["value"], params["adv"]

    Din = R + L + A
    Din_pad = _round_up(Din, 8)
    out_dim = A * bins * atoms
    out_pad = _round_up(out_dim, 128)
    slab_w = max(out_pad, _round_up(4 * F, 128), 128)

    def zf(*s):
        return jnp.zeros(s, jnp.float32)

    # Fused encoder weight over [rgb | low | prev_action | pad] input rows;
    # output lane order = [rgb_v | low_v | rgb_a | low_a].
    enc_rgb = jnp.concatenate([pv["rw"], zf(R, F), pa["rw"], zf(R, F)], axis=1)
    enc_low = jnp.concatenate([zf(L, F), pv["lw"], zf(L, F), pa["lw"]], axis=1)
    enc_w = jnp.concatenate([enc_rgb, enc_low, zf(Din_pad - R - L, 4 * F)], axis=0)

    g_enc = jnp.concatenate([pv["rg"], pv["lg"], pa["rg"], pa["lg"]], axis=1)
    b_enc = jnp.concatenate([pv["rb"], pv["lb"], pa["rb"], pa["lb"]], axis=1)

    # Trunk layer 1: block-diagonal over branches; prev_action rows reuse the
    # fused obs input; level rows become a per-level pre-LN bias table.
    w1h = jnp.concatenate(
        [jnp.concatenate([pv["w1"][:2 * F], zf(2 * F, H)], axis=1),
         jnp.concatenate([zf(2 * F, H), pa["w1"][:2 * F]], axis=1)],
        axis=0)                                                        # (4F, 2H)
    w1x_act = jnp.concatenate([pv["w1"][2 * F:2 * F + A],
                               pa["w1"][2 * F:2 * F + A]], axis=1)     # (A, 2H)
    w1x = jnp.concatenate(
        [zf(R + L, 2 * H), w1x_act, zf(Din_pad - Din, 2 * H)], axis=0)  # (Din_pad, 2H)
    lvl_tbl = jnp.concatenate([pv["w1"][2 * F + A:],
                               pa["w1"][2 * F + A:]], axis=1)          # (levels, 2H)

    g1 = jnp.concatenate([pv["g1"], pa["g1"]], axis=1)
    b1 = jnp.concatenate([pv["b1"], pa["b1"]], axis=1)

    # Trunk layer 2: block-diagonal.
    w2 = jnp.concatenate(
        [jnp.concatenate([pv["w2"], zf(H, H)], axis=1),
         jnp.concatenate([zf(H, H), pa["w2"]], axis=1)], axis=0)       # (2H, 2H)
    g2 = jnp.concatenate([pv["g2"], pa["g2"]], axis=1)
    b2 = jnp.concatenate([pv["b2"], pa["b2"]], axis=1)

    # Head with folded dueling combine:
    #   q = advs @ P + values @ E,  P = I - EᵀE/bins
    #   => q = z @ [hw_v @ E ; hw_a @ P] + (hb_v @ E + hb_a @ P)
    e = make_expand_matrix(A, bins, atoms)                       # (A*atoms, out)
    p = jnp.eye(out_dim, dtype=jnp.float32) - (e.T @ e) / bins   # (out, out)
    hw = jnp.concatenate([pv["hw"] @ e, pa["hw"] @ p], axis=0)   # (2H, out)
    hb = pv["hb"] @ e + pa["hb"] @ p                             # (1, out)
    hw = jnp.pad(hw, ((0, 0), (0, out_pad - out_dim)))           # lane-dense
    hb = jnp.pad(hb, ((0, 0), (0, out_pad - out_dim)))

    # Pack all tiny (1, N) rows + level-bias table into one f32 slab:
    #   row 0: g_enc   row 1: b_enc   rows 2-5: g1,b1,g2,b2   row 6: hb
    #   rows 7..7+levels-1: per-level pre-LN bias rows.
    def row(v):
        return jnp.pad(v, ((0, 0), (0, slab_w - v.shape[1])))
    slab_rows = [row(g_enc), row(b_enc), row(g1), row(b1), row(g2), row(b2),
                 row(hb)]
    slab_rows += [row(lvl_tbl[l:l + 1]) for l in range(levels)]
    slab = jnp.concatenate(slab_rows, axis=0)
    slab = jnp.pad(slab, ((0, _round_up(slab.shape[0], 8) - slab.shape[0]),
                          (0, 0)))

    cdt = matmul_dtype
    return dict(
        enc_w=enc_w.astype(cdt),
        m_enc=segment_mean_matrix(4, F).astype(cdt),   # entries 1/F: exact in bf16
        w1h=w1h.astype(cdt), w1x=w1x.astype(cdt),
        m_hid=segment_mean_matrix(2, H).astype(cdt),
        w2=w2.astype(cdt), hw=hw.astype(cdt),
        slab=slab,                                     # affine/bias rows stay f32
    )


# ----------------------------- wrapper ----------------------------------------


def c2f_critic_forward(level, rgb_obs, low_dim_obs, prev_action, prepped, cfg):
    B = rgb_obs.shape[0]
    A, bins, atoms, levels = (cfg["actor_dim"], cfg["bins"],
                              cfg["atoms"], cfg["levels"])
    F, H = cfg["feature_dim"], cfg["hidden_dim"]
    R, L = cfg["repr_dim"], cfg["low_dim"]
    out_dim = A * bins * atoms
    out_pad = _round_up(out_dim, 128)
    Din = R + L + A
    Din_pad = _round_up(Din, 8)

    # Per-call glue is just one concat (+ zero pad lanes) and one scalar cast.
    parts = [rgb_obs, low_dim_obs, prev_action]
    if Din_pad > Din:
        parts.append(jnp.zeros((B, Din_pad - Din), rgb_obs.dtype))
    obs = jnp.concatenate(parts, axis=-1)
    lvl = jnp.asarray(level, dtype=jnp.int32).reshape((1,))

    inputs = [lvl, obs,
              prepped["enc_w"], prepped["m_enc"], prepped["w1h"],
              prepped["w1x"], prepped["m_hid"], prepped["w2"],
              prepped["hw"], prepped["slab"]]
    in_specs = ([pl.BlockSpec(memory_space=pltpu.MemorySpace.SMEM)]
                + [pl.BlockSpec(memory_space=pltpu.MemorySpace.VMEM)]
                * (len(inputs) - 1))

    F4, H2 = 4 * F, 2 * H
    gemm_flops = 2 * B * (Din_pad * F4 + F4 * H2 + Din_pad * H2
                          + H2 * H2 + H2 * out_pad)
    ln_flops = 2 * (2 * B) * (F4 * F4 + 2 * H2 * H2)   # both trunk LNs counted
    bytes_accessed = int(sum(x.size * x.dtype.itemsize for x in inputs)
                         + B * out_pad * 4)
    cost = pl.CostEstimate(flops=int(gemm_flops + ln_flops),
                           transcendentals=int(B * (F4 + 2 * H2)),
                           bytes_accessed=bytes_accessed)

    kernel = functools.partial(c2f_critic_kernel, num_levels=levels)
    q_pad = pl.pallas_call(
        kernel,
        out_shape=jax.ShapeDtypeStruct((B, out_pad), jnp.float32),
        in_specs=in_specs,
        out_specs=pl.BlockSpec(memory_space=pltpu.MemorySpace.VMEM),
        cost_estimate=cost,
    )(*inputs)
    # TODO(synk): for large batches add a leading batch-tile grid axis with
    # compiler_params=pltpu.CompilerParams(dimension_semantics=("parallel",))
    # so v7x shards rows across both TensorCores; size the tile against the
    # 64 MiB v7x VMEM ceiling (weights here are ~0.3 MiB, so activations rule).
    return q_pad[:, :out_dim].reshape(B, A, bins, atoms)


# ----------------------------- reference (pure JAX) ----------------------------


def reference_forward(level, rgb_obs, low_dim_obs, prev_action, params, cfg):
    B = rgb_obs.shape[0]
    A, bins, atoms, levels = (cfg["actor_dim"], cfg["bins"],
                              cfg["atoms"], cfg["levels"])
    level_id = jnp.broadcast_to(
        jnp.eye(levels, dtype=rgb_obs.dtype)[level], (B, levels))

    def ln(x, g, b):
        mu = x.mean(-1, keepdims=True)
        var = jnp.square(x - mu).mean(-1, keepdims=True)
        return (x - mu) / jnp.sqrt(var + LN_EPS) * g + b

    def silu(x):
        return x * jax.nn.sigmoid(x)

    def branch(p, out_shape):
        h = jnp.concatenate(
            [jnp.tanh(ln(rgb_obs @ p["rw"], p["rg"], p["rb"])),
             jnp.tanh(ln(low_dim_obs @ p["lw"], p["lg"], p["lb"]))], axis=-1)
        x = jnp.concatenate([h, prev_action, level_id], axis=-1)
        z = silu(ln(x @ p["w1"], p["g1"], p["b1"]))
        z = silu(ln(z @ p["w2"], p["g2"], p["b2"]))
        return (z @ p["hw"] + p["hb"]).reshape(out_shape)

    values = branch(params["value"], (B, A, 1, atoms))
    advs = branch(params["adv"], (B, A, bins, atoms))
    return values + advs - advs.mean(-2, keepdims=True)


# ----------------------------- parameter init ----------------------------------


def init_branch_params(key, cfg, head_out):
    R, L, F, H = cfg["repr_dim"], cfg["low_dim"], cfg["feature_dim"], cfg["hidden_dim"]
    in1 = 2 * F + cfg["actor_dim"] + cfg["levels"]
    ks = jax.random.split(key, 5)

    def lin(k, fan_in, fan_out):
        return (jax.random.normal(k, (fan_in, fan_out), jnp.float32)
                / jnp.sqrt(jnp.float32(fan_in)))

    return dict(
        rw=lin(ks[0], R, F),
        rg=jnp.ones((1, F), jnp.float32), rb=jnp.zeros((1, F), jnp.float32),
        lw=lin(ks[1], L, F),
        lg=jnp.ones((1, F), jnp.float32), lb=jnp.zeros((1, F), jnp.float32),
        w1=lin(ks[2], in1, H),
        g1=jnp.ones((1, H), jnp.float32), b1=jnp.zeros((1, H), jnp.float32),
        w2=lin(ks[3], H, H),
        g2=jnp.ones((1, H), jnp.float32), b2=jnp.zeros((1, H), jnp.float32),
        hw=lin(ks[4], H, head_out) * HEAD_SCALE,
        hb=jnp.zeros((1, head_out), jnp.float32) + 0.01,
    )


# ----------------------------- main --------------------------------------------


if __name__ == "__main__":
    cfg = dict(repr_dim=32, low_dim=8, actor_dim=4, feature_dim=32,
               hidden_dim=32, levels=3, bins=5, atoms=8)
    B = 8
    level = 1

    key = jax.random.PRNGKey(0)
    k_rgb, k_low, k_act, k_vp, k_ap = jax.random.split(key, 5)

    rgb_obs = jax.random.normal(k_rgb, (B, cfg["repr_dim"]), jnp.float32)
    low_dim_obs = jax.random.normal(k_low, (B, cfg["low_dim"]), jnp.float32)
    prev_action = jax.random.normal(k_act, (B, cfg["actor_dim"]), jnp.float32)

    params = dict(
        value=init_branch_params(k_vp, cfg, cfg["actor_dim"] * 1 * cfg["atoms"]),
        adv=init_branch_params(k_ap, cfg,
                               cfg["actor_dim"] * cfg["bins"] * cfg["atoms"]),
    )

    fwd = jax.jit(
        lambda lv, r, lo, a, pp: c2f_critic_forward(lv, r, lo, a, pp, cfg))

    # f32 MXU operands: tight check against the pure-JAX reference.
    prepped_f32 = prepare_params(params, cfg, matmul_dtype=jnp.float32)
    q = jax.block_until_ready(
        fwd(jnp.int32(level), rgb_obs, low_dim_obs, prev_action, prepped_f32))

    q_ref = reference_forward(level, rgb_obs, low_dim_obs, prev_action, params, cfg)
    assert q.shape == (B, cfg["actor_dim"], cfg["bins"], cfg["atoms"]), q.shape
    assert jnp.allclose(q, q_ref, atol=5e-4, rtol=5e-4), (
        float(jnp.max(jnp.abs(q - q_ref))))

    # bf16 MXU operands (recommended default on v6e/v7x); elementwise math
    # (LayerNorm arithmetic, tanh, SiLU) stays f32 — required on v5e.
    prepped_bf16 = prepare_params(params, cfg, matmul_dtype=jnp.bfloat16)
    q_bf16 = jax.block_until_ready(
        fwd(jnp.int32(level), rgb_obs, low_dim_obs, prev_action, prepped_bf16))
    assert q_bf16.shape == q.shape
    assert float(jnp.max(jnp.abs(q_bf16 - q))) < 5e-2, (
        float(jnp.max(jnp.abs(q_bf16 - q))))

    print("KERNEL_OK")
</pallas_src>

<mosaic_0001>
module attributes {stable_mosaic.version = 11 : i64} {
  func.func @c2f_critic_kernel(%arg0: memref<1xi32, #tpu.memory_space<smem>>, %arg1: memref<8x48xf32, #tpu.memory_space<vmem>>, %arg2: memref<48x128xf32, #tpu.memory_space<vmem>>, %arg3: memref<128x128xf32, #tpu.memory_space<vmem>>, %arg4: memref<128x64xf32, #tpu.memory_space<vmem>>, %arg5: memref<48x64xf32, #tpu.memory_space<vmem>>, %arg6: memref<64x64xf32, #tpu.memory_space<vmem>>, %arg7: memref<64x64xf32, #tpu.memory_space<vmem>>, %arg8: memref<64x256xf32, #tpu.memory_space<vmem>>, %arg9: memref<16x256xf32, #tpu.memory_space<vmem>>, %arg10: memref<8x256xf32, #tpu.memory_space<vmem>>) attributes {dimension_semantics = [], scalar_prefetch = 0 : i64, scratch_operands = 0 : i64, tpu.core_type = #tpu.core_type<tc>} {
    %c0 = arith.constant 0 : index
    %c0_0 = arith.constant 0 : index
    %0 = vector.load %arg9[%c0, %c0_0] : memref<16x256xf32, #tpu.memory_space<vmem>>, vector<1x128xf32>
    %c1 = arith.constant 1 : index
    %c0_1 = arith.constant 0 : index
    %1 = vector.load %arg9[%c1, %c0_1] : memref<16x256xf32, #tpu.memory_space<vmem>>, vector<1x128xf32>
    %c2 = arith.constant 2 : index
    %c0_2 = arith.constant 0 : index
    %2 = vector.load %arg9[%c2, %c0_2] : memref<16x256xf32, #tpu.memory_space<vmem>>, vector<1x64xf32>
    %c3 = arith.constant 3 : index
    %c0_3 = arith.constant 0 : index
    %3 = vector.load %arg9[%c3, %c0_3] : memref<16x256xf32, #tpu.memory_space<vmem>>, vector<1x64xf32>
    %c4 = arith.constant 4 : index
    %c0_4 = arith.constant 0 : index
    %4 = vector.load %arg9[%c4, %c0_4] : memref<16x256xf32, #tpu.memory_space<vmem>>, vector<1x64xf32>
    %c5 = arith.constant 5 : index
    %c0_5 = arith.constant 0 : index
    %5 = vector.load %arg9[%c5, %c0_5] : memref<16x256xf32, #tpu.memory_space<vmem>>, vector<1x64xf32>
    %c6 = arith.constant 6 : index
    %c0_6 = arith.constant 0 : index
    %6 = vector.load %arg9[%c6, %c0_6] : memref<16x256xf32, #tpu.memory_space<vmem>>, vector<1x256xf32>
    %c0_7 = arith.constant 0 : index
    %7 = memref.load %arg0[%c0_7] : memref<1xi32, #tpu.memory_space<smem>>
    %cst = arith.constant 0.000000e+00 : f32
    %8 = vector.broadcast %cst : f32 to vector<1x64xf32>
    %c0_i32 = arith.constant 0 : i32
    %9 = arith.cmpi eq, %7, %c0_i32 : i32
    %c7 = arith.constant 7 : index
    %c0_8 = arith.constant 0 : index
    %10 = vector.load %arg9[%c7, %c0_8] : memref<16x256xf32, #tpu.memory_space<vmem>>, vector<1x64xf32>
    %11 = arith.select %9, %10, %8 : vector<1x64xf32>
    %c1_i32 = arith.constant 1 : i32
    %12 = arith.cmpi eq, %7, %c1_i32 : i32
    %c8 = arith.constant 8 : index
    %c0_9 = arith.constant 0 : index
    %13 = vector.load %arg9[%c8, %c0_9] : memref<16x256xf32, #tpu.memory_space<vmem>>, vector<1x64xf32>
    %14 = arith.select %12, %13, %11 : vector<1x64xf32>
    %c2_i32 = arith.constant 2 : i32
    %15 = arith.cmpi eq, %7, %c2_i32 : i32
    %c9 = arith.constant 9 : index
    %c0_10 = arith.constant 0 : index
    %16 = vector.load %arg9[%c9, %c0_10] : memref<16x256xf32, #tpu.memory_space<vmem>>, vector<1x64xf32>
    %17 = arith.select %15, %16, %14 : vector<1x64xf32>
    %c0_11 = arith.constant 0 : index
    %c0_12 = arith.constant 0 : index
    %18 = vector.load %arg1[%c0_11, %c0_12] : memref<8x48xf32, #tpu.memory_space<vmem>>, vector<8x48xf32>
    %c0_13 = arith.constant 0 : index
    %c0_14 = arith.constant 0 : index
    %19 = vector.load %arg2[%c0_13, %c0_14] : memref<48x128xf32, #tpu.memory_space<vmem>>, vector<48x128xf32>
    %cst_15 = arith.constant dense<0.000000e+00> : vector<8x128xf32>
    %20 = tpu.matmul %18, %19, %cst_15 {dimension_numbers = #tpu.dot_dimension_numbers<[1], [0], [0], [1], [0, 0, 1, 1], [], []>} : vector<8x48xf32>, vector<48x128xf32>, vector<8x128xf32> -> vector<8x128xf32>
    %c0_16 = arith.constant 0 : index
    %c0_17 = arith.constant 0 : index
    %21 = vector.load %arg3[%c0_16, %c0_17] : memref<128x128xf32, #tpu.memory_space<vmem>>, vector<128x128xf32>
    %22 = arith.mulf %20, %20 : vector<8x128xf32>
    %23 = tpu.concatenate %20, %22 in 0 : vector<8x128xf32>, vector<8x128xf32> -> vector<16x128xf32>
    %cst_18 = arith.constant dense<0.000000e+00> : vector<16x128xf32>
    %24 = tpu.matmul %23, %21, %cst_18 {dimension_numbers = #tpu.dot_dimension_numbers<[1], [0], [0], [1], [0, 0, 1, 1], [], []>} : vector<16x128xf32>, vector<128x128xf32>, vector<16x128xf32> -> vector<16x128xf32>
    %25 = vector.extract_strided_slice %24 {offsets = [0, 0], sizes = [8, 128], strides = [1, 1]} : vector<16x128xf32> to vector<8x128xf32>
    %26 = vector.extract_strided_slice %24 {offsets = [8, 0], sizes = [8, 128], strides = [1, 1]} : vector<16x128xf32> to vector<8x128xf32>
    %27 = arith.mulf %25, %25 : vector<8x128xf32>
    %28 = arith.subf %26, %27 : vector<8x128xf32>
    %29 = arith.subf %20, %25 : vector<8x128xf32>
    %cst_19 = arith.constant 9.99999974E-6 : f32
    %30 = vector.broadcast %cst_19 : f32 to vector<8x128xf32>
    %31 = arith.addf %28, %30 : vector<8x128xf32>
    %32 = math.rsqrt %31 : vector<8x128xf32>
    %33 = arith.mulf %29, %32 : vector<8x128xf32>
    %34 = vector.broadcast %0 : vector<1x128xf32> to vector<8x128xf32>
    %35 = arith.mulf %33, %34 : vector<8x128xf32>
    %36 = vector.broadcast %1 : vector<1x128xf32> to vector<8x128xf32>
    %37 = arith.addf %35, %36 : vector<8x128xf32>
    %38 = math.tanh %37 : vector<8x128xf32>
    %c0_20 = arith.constant 0 : index
    %c0_21 = arith.constant 0 : index
    %39 = vector.load %arg4[%c0_20, %c0_21] : memref<128x64xf32, #tpu.memory_space<vmem>>, vector<128x64xf32>
    %cst_22 = arith.constant dense<0.000000e+00> : vector<8x64xf32>
    %40 = tpu.matmul %38, %39, %cst_22 {dimension_numbers = #tpu.dot_dimension_numbers<[1], [0], [0], [1], [0, 0, 1, 1], [], []>} : vector<8x128xf32>, vector<128x64xf32>, vector<8x64xf32> -> vector<8x64xf32>
    %c0_23 = arith.constant 0 : index
    %c0_24 = arith.constant 0 : index
    %41 = vector.load %arg5[%c0_23, %c0_24] : memref<48x64xf32, #tpu.memory_space<vmem>>, vector<48x64xf32>
    %cst_25 = arith.constant dense<0.000000e+00> : vector<8x64xf32>
    %42 = tpu.matmul %18, %41, %cst_25 {dimension_numbers = #tpu.dot_dimension_numbers<[1], [0], [0], [1], [0, 0, 1, 1], [], []>} : vector<8x48xf32>, vector<48x64xf32>, vector<8x64xf32> -> vector<8x64xf32>
    %43 = arith.addf %40, %42 : vector<8x64xf32>
    %44 = vector.broadcast %17 : vector<1x64xf32> to vector<8x64xf32>
    %45 = arith.addf %43, %44 : vector<8x64xf32>
    %c0_26 = arith.constant 0 : index
    %c0_27 = arith.constant 0 : index
    %46 = vector.load %arg6[%c0_26, %c0_27] : memref<64x64xf32, #tpu.memory_space<vmem>>, vector<64x64xf32>
    %47 = arith.mulf %45, %45 : vector<8x64xf32>
    %48 = tpu.concatenate %45, %47 in 0 : vector<8x64xf32>, vector<8x64xf32> -> vector<16x64xf32>
    %cst_28 = arith.constant dense<0.000000e+00> : vector<16x64xf32>
    %49 = tpu.matmul %48, %46, %cst_28 {dimension_numbers = #tpu.dot_dimension_numbers<[1], [0], [0], [1], [0, 0, 1, 1], [], []>} : vector<16x64xf32>, vector<64x64xf32>, vector<16x64xf32> -> vector<16x64xf32>
    %50 = vector.extract_strided_slice %49 {offsets = [0, 0], sizes = [8, 64], strides = [1, 1]} : vector<16x64xf32> to vector<8x64xf32>
    %51 = vector.extract_strided_slice %49 {offsets = [8, 0], sizes = [8, 64], strides = [1, 1]} : vector<16x64xf32> to vector<8x64xf32>
    %52 = arith.mulf %50, %50 : vector<8x64xf32>
    %53 = arith.subf %51, %52 : vector<8x64xf32>
    %54 = arith.subf %45, %50 : vector<8x64xf32>
    %cst_29 = arith.constant 9.99999974E-6 : f32
    %55 = vector.broadcast %cst_29 : f32 to vector<8x64xf32>
    %56 = arith.addf %53, %55 : vector<8x64xf32>
    %57 = math.rsqrt %56 : vector<8x64xf32>
    %58 = arith.mulf %54, %57 : vector<8x64xf32>
    %59 = vector.broadcast %2 : vector<1x64xf32> to vector<8x64xf32>
    %60 = arith.mulf %58, %59 : vector<8x64xf32>
    %61 = vector.broadcast %3 : vector<1x64xf32> to vector<8x64xf32>
    %62 = arith.addf %60, %61 : vector<8x64xf32>
    %63 = arith.negf %62 : vector<8x64xf32>
    %64 = math.exp %63 : vector<8x64xf32>
    %cst_30 = arith.constant 1.000000e+00 : f32
    %65 = vector.broadcast %cst_30 : f32 to vector<8x64xf32>
    %66 = arith.addf %65, %64 : vector<8x64xf32>
    %67 = arith.divf %65, %66 : vector<8x64xf32>
    %68 = arith.mulf %62, %67 : vector<8x64xf32>
    %c0_31 = arith.constant 0 : index
    %c0_32 = arith.constant 0 : index
    %69 = vector.load %arg7[%c0_31, %c0_32] : memref<64x64xf32, #tpu.memory_space<vmem>>, vector<64x64xf32>
    %cst_33 = arith.constant dense<0.000000e+00> : vector<8x64xf32>
    %70 = tpu.matmul %68, %69, %cst_33 {dimension_numbers = #tpu.dot_dimension_numbers<[1], [0], [0], [1], [0, 0, 1, 1], [], []>} : vector<8x64xf32>, vector<64x64xf32>, vector<8x64xf32> -> vector<8x64xf32>
    %c0_34 = arith.constant 0 : index
    %c0_35 = arith.constant 0 : index
    %71 = vector.load %arg6[%c0_34, %c0_35] : memref<64x64xf32, #tpu.memory_space<vmem>>, vector<64x64xf32>
    %72 = arith.mulf %70, %70 : vector<8x64xf32>
    %73 = tpu.concatenate %70, %72 in 0 : vector<8x64xf32>, vector<8x64xf32> -> vector<16x64xf32>
    %cst_36 = arith.constant dense<0.000000e+00> : vector<16x64xf32>
    %74 = tpu.matmul %73, %71, %cst_36 {dimension_numbers = #tpu.dot_dimension_numbers<[1], [0], [0], [1], [0, 0, 1, 1], [], []>} : vector<16x64xf32>, vector<64x64xf32>, vector<16x64xf32> -> vector<16x64xf32>
    %75 = vector.extract_strided_slice %74 {offsets = [0, 0], sizes = [8, 64], strides = [1, 1]} : vector<16x64xf32> to vector<8x64xf32>
    %76 = vector.extract_strided_slice %74 {offsets = [8, 0], sizes = [8, 64], strides = [1, 1]} : vector<16x64xf32> to vector<8x64xf32>
    %77 = arith.mulf %75, %75 : vector<8x64xf32>
    %78 = arith.subf %76, %77 : vector<8x64xf32>
    %79 = arith.subf %70, %75 : vector<8x64xf32>
    %cst_37 = arith.constant 9.99999974E-6 : f32
    %80 = vector.broadcast %cst_37 : f32 to vector<8x64xf32>
    %81 = arith.addf %78, %80 : vector<8x64xf32>
    %82 = math.rsqrt %81 : vector<8x64xf32>
    %83 = arith.mulf %79, %82 : vector<8x64xf32>
    %84 = vector.broadcast %4 : vector<1x64xf32> to vector<8x64xf32>
    %85 = arith.mulf %83, %84 : vector<8x64xf32>
    %86 = vector.broadcast %5 : vector<1x64xf32> to vector<8x64xf32>
    %87 = arith.addf %85, %86 : vector<8x64xf32>
    %88 = arith.negf %87 : vector<8x64xf32>
    %89 = math.exp %88 : vector<8x64xf32>
    %cst_38 = arith.constant 1.000000e+00 : f32
    %90 = vector.broadcast %cst_38 : f32 to vector<8x64xf32>
    %91 = arith.addf %90, %89 : vector<8x64xf32>
    %92 = arith.divf %90, %91 : vector<8x64xf32>
    %93 = arith.mulf %87, %92 : vector<8x64xf32>
    %c0_39 = arith.constant 0 : index
    %c0_40 = arith.constant 0 : index
    %94 = vector.load %arg8[%c0_39, %c0_40] : memref<64x256xf32, #tpu.memory_space<vmem>>, vector<64x256xf32>
    %cst_41 = arith.constant dense<0.000000e+00> : vector<8x256xf32>
    %95 = tpu.matmul %93, %94, %cst_41 {dimension_numbers = #tpu.dot_dimension_numbers<[1], [0], [0], [1], [0, 0, 1, 1], [], []>} : vector<8x64xf32>, vector<64x256xf32>, vector<8x256xf32> -> vector<8x256xf32>
    %96 = vector.broadcast %6 : vector<1x256xf32> to vector<8x256xf32>
    %97 = arith.addf %95, %96 : vector<8x256xf32>
    %c0_42 = arith.constant 0 : index
    %c0_43 = arith.constant 0 : index
    %98 = vector.load %arg10[%c0_42, %c0_43] : memref<8x256xf32, #tpu.memory_space<vmem>>, vector<8x256xf32>
    tpu.vector_store %arg10[%c0_42, %c0_43], %97 {strides = array<i32>} : memref<8x256xf32, #tpu.memory_space<vmem>>, vector<8x256xf32>,
    return
  }
}

</mosaic_0001>

<bundles_post_ra>
// kernel: _lambda_.1
= control target key start
LH: loop header
LB: loop body
LE: loop exit
PB: predicated region body
PF: predicated region fallthrough
CT: control target
= control target key end

     0   :  { %16 = vsyncpa [#allocation4], 0  ;;  %s919_s0 = inlined_call_operand.<no memory space> [shape: s32[1], index: 0, kind: input, shape index: {}]   ;;  %s920_s1 = inlined_call_operand.vmem [shape: f32[8,48], index: 1, kind: input, shape index: {}]   ;;  %s921_s2 = inlined_call_operand.vmem [shape: f32[48,128], index: 2, kind: input, shape index: {}]   ;;  %s922_s3 = inlined_call_operand.vmem [shape: f32[128,128], index: 3, kind: input, shape index: {}]   ;;  %s923_s4 = inlined_call_operand.vmem [shape: f32[128,64], index: 4, kind: input, shape index: {}]   ;;  %s924_s5 = inlined_call_operand.hbm [shape: f32[48,64], index: 5, kind: input, shape index: {}]   ;;  %s925_s6 = inlined_call_operand.vmem [shape: f32[64,64], index: 6, kind: input, shape index: {}]   ;;  %s926_s7 = inlined_call_operand.hbm [shape: f32[64,64], index: 7, kind: input, shape index: {}]   ;;  %s927_s8 = inlined_call_operand.hbm [shape: f32[64,256], index: 8, kind: input, shape index: {}]   ;;  %s928_s9 = inlined_call_operand.hbm [shape: f32[16,256], index: 9, kind: input, shape index: {}]   ;;  %s929_s10 = inlined_call_operand.vmem [shape: f32[8,256], index: 10, kind: output, shape index: {}]  }
   0x1   :  { %17 = vsyncpa [#allocation6], 0 }
   0x2   :  { %18 = vsyncpa [#allocation9], 0  ;;  %s48_s15 = sshll.u32 %s926_s7, 4  ;;  %s665_s16 = smov [#allocation5]   ;;  %s49_s15 = int_to_ptr.hbm [resolvable:$true] %s48_s15 }
   0x3   :  { %s50_s17 = sshll.u32 %s665_s16, 4  ;;  %s33_s20 = sshll.u32 %s924_s5, 4  ;;  %s51_s17 = int_to_ptr.vmem [resolvable:$true] %s50_s17  ;;  %s34_s20 = int_to_ptr.hbm [resolvable:$true] %s33_s20 }
   0x4   :  { %s666_s21 = smov 128   ;;  %s667_s22 = smov 8  }
   0x5   :  { %56 = dma.hbm_to_vmem [thread:$0]  %s49_s15, 1024, %s51_s17, [#allocation6], %s666_s21, %s666_s21, %s667_s22  }
   0x6   :  { %s668_s23 = smov [#allocation3]   ;;  %s61_s27 = sshll.u32 %s927_s8, 4  ;;  %s62_s27 = int_to_ptr.hbm [resolvable:$true] %s61_s27 }
   0x7   :  { %s35_s24 = sshll.u32 %s668_s23, 4  ;;  %s669_s7 = smov [#allocation7]   ;;  %s36_s24 = int_to_ptr.vmem [resolvable:$true] %s35_s24 }
   0x8   :  { %41 = dma.hbm_to_vmem [thread:$0]  %s34_s20, 768, %s36_s24, [#allocation4], %s666_s21, %s666_s21, %s667_s22  }
   0x9   :  { %s63_s28 = sshll.u32 %s669_s7, 4  ;;  %s74_s5 = sshll.u32 %s928_s9, 4  ;;  %s64_s28 = int_to_ptr.vmem [resolvable:$true] %s63_s28  ;;  %s75_s5 = int_to_ptr.hbm [resolvable:$true] %s74_s5 }
   0xa   :  { %s670_s11 = smov 256   ;;  %s671_s12 = smov 16  }
   0xb   :  { %69 = dma.hbm_to_vmem [thread:$0]  %s62_s27, 2048, %s64_s28, [#allocation6], %s670_s11, %s670_s11, %s671_s12  }
   0xc   :  { %s672_s13 = smov [#allocation8]  }
   0xd   :  { %s76_s14 = sshll.u32 %s672_s13, 4  ;;  %s77_s14 = int_to_ptr.vmem [resolvable:$true] %s76_s14 }
   0xe   :  { %82 = dma.hbm_to_vmem [thread:$0]  %s75_s5, 512, %s77_s14, [#allocation9], %s670_s11, %s670_s11, %s671_s12  }
   0xf   :  { %659 = dma.done.wait [#allocation4], 768  }
  0x10   :  { %660 = vsyncadd [#allocation4], 4294966528 }
  0x11   :  { %661 = dma.done.wait [#allocation6], 3072  }
  0x12   :  { %662 = vsyncadd [#allocation6], 4294964224 }
  0x13   :  { %663 = dma.done.wait [#allocation9], 512  }
  0x14   :  { %664 = vsyncadd [#allocation9], 4294966784  ;;  %v132_v0 = vld [vmem:[%s921_s2 + $0x28] sm:$0xff]  ;;  %v131_v1 = vld [vmem:[%s921_s2 + $0x20] sm:$0xff]  ;;  %vm133_vm0 = vcmask 392192   ;;  %p108_p0 = scmp.eq.s32.totalorder %s919_s0, 0 }
  0x15   :  { %147 = vmatpush.msra.mxu3 %v132_v0  ;;  %v130_v2 = vld [vmem:[%s921_s2 + $0x18] sm:$0xff]  ;;  %v171_v4 = vld [vmem:[%s922_s3 + $0x70] sm:$0xff]  ;;  %v170_v6 = vld [vmem:[%s922_s3 + $0x68] sm:$0xff]  ;;  %p114_p1 = scmp.eq.s32.totalorder %s919_s0, 1  ;;  %p120_p2 = scmp.eq.s32.totalorder %s919_s0, 2  ;;  %vm287_vm6 = vcmask 523264  }
  0x16   :  { %v172_v3 = vld [vmem:[%s922_s3 + $0x78] sm:$0xff]  ;;  %v129_v5 = vld [vmem:[%s921_s2 + $0x10] sm:$0xff]  ;;  %v128_v7 = vld [vmem:[%s921_s2 + $0x8] sm:$0xff]  ;;  %s545_s13 = scalar_select %p108_p0, 255, 0 }
  0x17   :  { %148 = vmatpush.msra.mxu3 %v131_v1  ;;  %174 = vmatpush.msra.mxu1 %v172_v3  ;;  %v169_v8 = vld [vmem:[%s922_s3 + $0x60] sm:$0xff]  ;;  %v168_v10 = vld [vmem:[%s922_s3 + $0x58] sm:$0xff]  ;;  %v167_v12 = vld [vmem:[%s922_s3 + $0x50] sm:$0xff]  ;;  %s116_s5 = scalar_select %p114_p1, 1, 0 }
  0x18   :  { %v127_v9 = vld [vmem:[%s921_s2] sm:$0xff]  ;;  %v166_v13 = vld [vmem:[%s922_s3 + $0x48] sm:$0xff]  ;;  %v164_v15 = vld [vmem:[%s922_s3 + $0x38] sm:$0xff]  ;;  %s122_s11 = scalar_select %p120_p2, 1, 0 }
  0x19   :  { %149 = vmatpush.msra.mxu3 %v130_v2  ;;  %175 = vmatpush.msra.mxu1 %v171_v4  ;;  %v776_v11 = vld [vmem:[%s920_s1] sm:$0xff]  ;;  %v163_v16 = vld [vmem:[%s922_s3 + $0x30] sm:$0xff]  ;;  %v162_v17 = vld [vmem:[%s922_s3 + $0x28] sm:$0xff] }
  0x1a   :  { %v165_v14 = vld [vmem:[%s922_s3 + $0x40] sm:$0xff]  ;;  %v160_v19 = vld [vmem:[%s922_s3 + $0x18] sm:$0xff]  ;;  %v159_v20 = vld [vmem:[%s922_s3 + $0x10] sm:$0xff] }
  0x1b   :  { %150 = vmatpush.msra.mxu3 %v129_v5  ;;  %176 = vmatpush.msra.mxu1 %v170_v6  ;;  %v161_v18 = vld [vmem:[%s922_s3 + $0x20] sm:$0xff]  ;;  %v158_v21 = vld [vmem:[%s922_s3 + $0x8] sm:$0xff]  ;;  %v230_v25 = vld [vmem:[%s923_s4 + $0x78] sm:$0xff] }
  0x1c   :  { %v157_v22 = vld [vmem:[%s922_s3] sm:$0xff]  ;;  %v229_v26 = vld [vmem:[%s923_s4 + $0x70] sm:$0xff]  ;;  %v228_v27 = vld [vmem:[%s923_s4 + $0x68] sm:$0xff] }
  0x1d   :  { %151 = vmatpush.msra.mxu3 %v128_v7  ;;  %177 = vmatpush.msra.mxu1 %v169_v8  ;;  %v227_v28 = vld [vmem:[%s923_s4 + $0x60] sm:$0xff]  ;;  %v226_v29 = vld [vmem:[%s923_s4 + $0x58] sm:$0xff]  ;;  %v225_v30 = vld [vmem:[%s923_s4 + $0x50] sm:$0xff] }
  0x1e   :  { %v224_v31 = vld [vmem:[%s923_s4 + $0x48] sm:$0xff]  ;;  %v223_v32 = vld [vmem:[%s923_s4 + $0x40] sm:$0xff]  ;;  %v222_v33 = vld [vmem:[%s923_s4 + $0x38] sm:$0xff] }
  0x1f   :  { %152 = vmatpush.msra.mxu3 %v127_v9  ;;  %178 = vmatpush.msra.mxu1 %v168_v10  ;;  %v221_v34 = vld [vmem:[%s923_s4 + $0x30] sm:$0xff]  ;;  %v236_v36 = vld [vmem:[#allocation3 + $0x28] sm:$0xff]  ;;  %v235_v38 = vld [vmem:[#allocation3 + $0x20] sm:$0xff]  ;;  %v117_v10 = vstv %s116_s5 }
  0x20   :  { %525 = vmatmul.msk.f32.vlgmr.msra.gmra.mxu3 %vm133_vm0, %v776_v11  ;;  %v220_v37 = vld [vmem:[%s923_s4 + $0x28] sm:$0xff]  ;;  %247 = vmatpush.msra.mxu2 %v236_v36  ;;  %v219_v39 = vld [vmem:[%s923_s4 + $0x20] sm:$0xff]  ;;  %v234_v40 = vld [vmem:[#allocation3 + $0x18] sm:$0xff]  ;;  %vm118_vm4 = vcmp.eq.s32.totalorder %v117_v10, 1 }
  0x21   :  { %179 = vmatpush.msra.mxu1 %v167_v12  ;;  %257 = vmatpush.msrb.mxu3 %v230_v25  ;;  %v218_v41 = vld [vmem:[%s923_s4 + $0x18] sm:$0xff]  ;;  %v233_v42 = vld [vmem:[#allocation3 + $0x10] sm:$0xff]  ;;  %v232_v44 = vld [vmem:[#allocation3 + $0x8] sm:$0xff] }
  0x22   :  { %248 = vmatpush.msra.mxu2 %v235_v38  ;;  %v217_v43 = vld [vmem:[%s923_s4 + $0x10] sm:$0xff]  ;;  %v216_v45 = vld [vmem:[%s923_s4 + $0x8] sm:$0xff]  ;;  %v231_v48 = vld [vmem:[#allocation3] sm:$0xff] }
  0x23   :  { %180 = vmatpush.msra.mxu1 %v166_v13  ;;  %258 = vmatpush.msrb.mxu3 %v229_v26  ;;  %v215_v49 = vld [vmem:[%s923_s4] sm:$0xff]  ;;  %v285_v52 = vld [vmem:[%s925_s6 + $0x38] sm:$0xff]  ;;  %v284_v53 = vld [vmem:[%s925_s6 + $0x30] sm:$0xff]  ;;  %v123_v13 = vstv %s122_s11 }
  0x24   :  { %249 = vmatpush.msra.mxu2 %v234_v40  ;;  %302 = vmatpush.msra.mxu0 %v285_v52  ;;  %v283_v54 = vld [vmem:[%s925_s6 + $0x28] sm:$0xff]  ;;  %v282_v55 = vld [vmem:[%s925_s6 + $0x20] sm:$0xff]  ;;  %v281_v56 = vld [vmem:[%s925_s6 + $0x18] sm:$0xff]  ;;  %vm124_vm5 = vcmp.eq.s32.totalorder %v123_v13, 1 }
  0x25   :  { %181 = vmatpush.msra.mxu1 %v165_v14  ;;  %259 = vmatpush.msrb.mxu3 %v228_v27  ;;  %v99_v0 = vld [vmem:[#allocation8] ss:$0 sm:$0xff]  ;;  %v100_v3 = vld [vmem:[#allocation8 + $0x1] ss:$0 sm:$0xff]  ;;  %v279_v8 = vld [vmem:[%s925_s6 + $0x8] sm:$0xff] }
  0x26   :  { %250 = vmatpush.msra.mxu2 %v233_v42  ;;  %303 = vmatpush.msra.mxu0 %v284_v53  ;;  %v280_v7 = vld [vmem:[%s925_s6 + $0x10] sm:$0xff]  ;;  %v278_v9 = vld [vmem:[%s925_s6] sm:$0xff]  ;;  %v359_v25 = vld [vmem:[#allocation5 + $0x28] sm:$0xff] }
  0x27   :  { %182 = vmatpush.msra.mxu1 %v164_v15  ;;  %260 = vmatpush.msrb.mxu3 %v227_v28  ;;  %v115_v12 = vld [vmem:[#allocation8 + $0x10] ss:$0 sm:$0xff]  ;;  %v121_v15 = vld [vmem:[#allocation8 + $0x11] ss:$0 sm:$0xff]  ;;  %v358_v26 = vld [vmem:[#allocation5 + $0x20] sm:$0xff] }
  0x28   :  { %251 = vmatpush.msra.mxu2 %v232_v44  ;;  %304 = vmatpush.msra.mxu0 %v283_v54  ;;  %v357_v27 = vld [vmem:[#allocation5 + $0x18] sm:$0xff]  ;;  %v460_v13 = vld [vmem:[#allocation7 + $0x40] sm:$0xff] }
  0x29   :  { %183 = vmatpush.msra.mxu1 %v163_v16  ;;  %261 = vmatpush.msrb.mxu3 %v226_v29  ;;  %v356_v29 = vld [vmem:[#allocation5 + $0x10] sm:$0xff]  ;;  %v463_v10 = vld [vmem:[#allocation7 + $0x58] sm:$0xff] }
  0x2a   :  { %252 = vmatpush.msra.mxu2 %v231_v48  ;;  %305 = vmatpush.msra.mxu0 %v282_v55 }
  0x2b   :  { %184 = vmatpush.msra.mxu1 %v162_v17  ;;  %262 = vmatpush.msrb.mxu3 %v225_v30 }
  0x2c   :  { %526 = vmatmul.msk.f32.vlgmr.msra.gmra.mxu2 %vm133_vm0, %v776_v11  ;;  %306 = vmatpush.msra.mxu0 %v281_v56  ;;  %v546_v11 = vld [vmem:[#allocation8 + $0x7] ss:$0 sm:%s545_s13] }
  0x2d   :  { %185 = vmatpush.msra.mxu1 %v161_v18  ;;  %263 = vmatpush.msrb.mxu3 %v224_v31  ;;  %v119_v14 = vsel %vm118_vm4, %v115_v12, %v546_v11 }
  0x2e   :  { %307 = vmatpush.msra.mxu0 %v280_v7  ;;  %v125_v17 = vsel %vm124_vm5, %v121_v15, %v119_v14  ;;  %v461_v14 = vld [vmem:[#allocation7 + $0x48] sm:$0xff] }
  0x2f   :  { %186 = vmatpush.msra.mxu1 %v160_v19  ;;  %264 = vmatpush.msrb.mxu3 %v223_v32  ;;  %v355_v32 = vld [vmem:[#allocation5 + $0x8] sm:$0xff] }
  0x30   :  { %308 = vmatpush.msra.mxu0 %v279_v8 }
  0x31   :  { %187 = vmatpush.msra.mxu1 %v159_v20  ;;  %265 = vmatpush.msrb.mxu3 %v222_v33 }
  0x32   :  { %309 = vmatpush.msra.mxu0 %v278_v9 }
  0x33   :  { %188 = vmatpush.msra.mxu1 %v158_v21  ;;  %266 = vmatpush.msrb.mxu3 %v221_v34  ;;  %v354_v34 = vld [vmem:[#allocation5] sm:$0xff] }
  0x34   :  { %400 = vmatpush.msrb.mxu0 %v285_v52 }
  0x35   :  { %189 = vmatpush.msra.mxu1 %v157_v22  ;;  %267 = vmatpush.msrb.mxu3 %v220_v37  ;;  %v361_v22 = vld [vmem:[#allocation5 + $0x38] sm:$0xff] }
  0x36   :  { %401 = vmatpush.msrb.mxu0 %v284_v53  ;;  %373 = vmatpush.msrb.mxu2 %v361_v22  ;;  %v454_v22 = vld [vmem:[#allocation7 + $0x10] sm:$0xff] }
  0x37   :  { %268 = vmatpush.msrb.mxu3 %v219_v39 }
  0x38   :  { %402 = vmatpush.msrb.mxu0 %v283_v54 }
  0x39   :  { %269 = vmatpush.msrb.mxu3 %v218_v41 }
  0x3a   :  { %403 = vmatpush.msrb.mxu0 %v282_v55 }
  0x3b   :  { %270 = vmatpush.msrb.mxu3 %v217_v43  ;;  %v101_v43 = vld [vmem:[#allocation8 + $0x2] ss:$0 sm:$0xff] }
  0x3c   :  { %404 = vmatpush.msrb.mxu0 %v281_v56 }
  0x3d   :  { %271 = vmatpush.msrb.mxu3 %v216_v45  ;;  %v102_v45 = vld [vmem:[#allocation8 + $0x3] ss:$0 sm:$0xff] }
  0x3e   :  { %405 = vmatpush.msrb.mxu0 %v280_v7  ;;  %v464_v7 = vld [vmem:[#allocation7 + $0x60] sm:$0xff] }
  0x3f   :  { %272 = vmatpush.msrb.mxu3 %v215_v49 }
  0x40   :  { %406 = vmatpush.msrb.mxu0 %v279_v8  ;;  %v465_v8 = vld [vmem:[#allocation7 + $0x68] sm:$0xff] }
  0x42   :  { %407 = vmatpush.msrb.mxu0 %v278_v9  ;;  %v462_v9 = vld [vmem:[#allocation7 + $0x50] sm:$0xff] }
  0xa3   :  { %v813_v23 = vpop.f32.mrf.mxu3 }
  0xa4   :  { %190 = vmatmul.f32.vlgmr.msra.gmra.mxu1 %v813_v23  ;;  %v173_v24 = vmul.f32 %v813_v23, %v813_v23 }
  0xac   :  { %193 = vmatmul.f32.gmra.mxu1 %v173_v24 }
  0xaf   :  { %v254_v16 = vpop.f32.mrf.mxu2 }
 0x121   :  { %v191_v35 = vpop.f32.mrf.mxu1 }
 0x122   :  { %v197_v46 = vmul.f32 %v191_v35, %v191_v35  ;;  %v199_v63 = vsub.f32 %v813_v23, %v191_v35  ;;  %v360_v23 = vld [vmem:[#allocation5 + $0x30] sm:$0xff] }
 0x123   :  { %374 = vmatpush.msrb.mxu2 %v360_v23  ;;  %v455_v23 = vld [vmem:[#allocation7 + $0x18] sm:$0xff] }
 0x125   :  { %375 = vmatpush.msrb.mxu2 %v359_v25  ;;  %v452_v25 = vld [vmem:[#allocation7] sm:$0xff] }
 0x127   :  { %376 = vmatpush.msrb.mxu2 %v358_v26  ;;  %v453_v26 = vld [vmem:[#allocation7 + $0x8] sm:$0xff] }
 0x129   :  { %v194_v47 = vpop.f32.mrf.mxu1  ;;  %377 = vmatpush.msrb.mxu2 %v357_v27 }
 0x12a   :  { %v198_v50 = vsub.f32 %v194_v47, %v197_v46 }
 0x12b   :  { %378 = vmatpush.msrb.mxu2 %v356_v29 }
 0x12c   :  { %v200_v51 = vadd.f32 1e-05, %v198_v50 }
 0x12d   :  { %379 = vmatpush.msrb.mxu2 %v355_v32 }
 0x12e   :  { %547 = vrsqrt.f32 %v200_v51  ;;  %vm207_vm2 = vweird.f32 %v200_v51 }
 0x12f   :  { %380 = vmatpush.msrb.mxu2 %v354_v34 }
 0x134   :  { %v548_v57 = vpop.eup %547 }
 0x135   :  { %v202_v58 = vmul.f32 %v548_v57, %v200_v51  ;;  %vm208_vm1 = vweird.f32 %v548_v57 }
 0x136   :  { %vm209_vm3 = vmor %vm207_vm2, %vm208_vm1 }
 0x137   :  { %v203_v59 = vmul.f32 %v548_v57, %v202_v58 }
 0x139   :  { %v204_v60 = vmul.f32 0.5, %v203_v59 }
 0x13b   :  { %v205_v61 = vsub.f32 1.5, %v204_v60 }
 0x13d   :  { %v206_v62 = vmul.f32 %v548_v57, %v205_v61 }
 0x13f   :  { %v210_v1 = vsel %vm209_vm3, %v548_v57, %v206_v62 }
 0x140   :  { %v211_v2 = vmul.f32 %v210_v1, %v199_v63 }
 0x142   :  { %v212_v4 = vmul.f32 %v211_v2, %v99_v0 }
 0x144   :  { %v213_v5 = vadd.f32 %v212_v4, %v100_v3 }
 0x146   :  { %549 = vtanh.f32 %v213_v5  ;;  %v466_v5 = vld [vmem:[#allocation7 + $0x70] sm:$0xff] }
 0x147   :  { %484 = vmatpush.msra.mxu2 %v466_v5 }
 0x149   :  { %485 = vmatpush.msra.mxu2 %v464_v7 }
 0x14b   :  { %486 = vmatpush.msra.mxu2 %v462_v9 }
 0x14c   :  { %v550_v6 = vpop.eup %549 }
 0x14d   :  { %273 = vmatmul.f32.vlgmr.msrb.gmra.mxu3 %v550_v6  ;;  %v467_v6 = vld [vmem:[#allocation7 + $0x78] sm:$0xff]  ;;  %487 = vmatpush.msra.mxu2 %v460_v13 }
 0x14e   :  { %504 = vmatpush.msrb.mxu1 %v467_v6 }
 0x150   :  { %505 = vmatpush.msrb.mxu1 %v465_v8 }
 0x152   :  { %506 = vmatpush.msrb.mxu1 %v463_v10 }
 0x154   :  { %507 = vmatpush.msrb.mxu1 %v461_v14 }
 0x1d0   :  { %v274_v18 = vpop.f32.mrf.mxu3 }
 0x1d1   :  { %v275_v19 = vadd.f32 %v274_v18, %v254_v16  ;;  %v458_v16 = vld [vmem:[#allocation7 + $0x30] sm:$0xff] }
 0x1d2   :  { %488 = vmatpush.msra.mxu2 %v458_v16 }
 0x1d3   :  { %v277_v20 = vadd.f32 %v275_v19, %v125_v17  ;;  %v459_v17 = vld [vmem:[#allocation7 + $0x38] sm:$0xff]  ;;  %v456_v19 = vld [vmem:[#allocation7 + $0x20] sm:$0xff] }
 0x1d4   :  { %508 = vmatpush.msrb.mxu1 %v459_v17  ;;  %489 = vmatpush.msra.mxu2 %v456_v19 }
 0x1d5   :  { %527 = vmatmul.msk.f32.vlgmr.msra.gmra.mxu0 %vm287_vm6, %v277_v20  ;;  %v286_v21 = vmul.f32 %v277_v20, %v277_v20 }
 0x1d6   :  { %490 = vmatpush.msra.mxu2 %v454_v22 }
 0x1d8   :  { %491 = vmatpush.msra.mxu2 %v452_v25 }
 0x1dd   :  { %528 = vmatmul.msk.f32.gmra.mxu0 %vm287_vm6, %v286_v21 }
 0x252   :  { %v311_v24 = vpop.f32.mrf.mxu0 }
 0x253   :  { %v317_v28 = vmul.f32 %v311_v24, %v311_v24  ;;  %v319_v41 = vsub.f32 %v277_v20, %v311_v24  ;;  %v457_v20 = vld [vmem:[#allocation7 + $0x28] sm:$0xff] }
 0x254   :  { %509 = vmatpush.msrb.mxu1 %v457_v20 }
 0x256   :  { %510 = vmatpush.msrb.mxu1 %v455_v23 }
 0x258   :  { %511 = vmatpush.msrb.mxu1 %v453_v26 }
 0x25a   :  { %v314_v30 = vpop.f32.mrf.mxu0 }
 0x25b   :  { %v318_v31 = vsub.f32 %v314_v30, %v317_v28  ;;  %v103_v28 = vld [vmem:[#allocation8 + $0x4] ss:$0 sm:$0xff] }
 0x25d   :  { %v320_v33 = vadd.f32 1e-05, %v318_v31  ;;  %v104_v31 = vld [vmem:[#allocation8 + $0x5] ss:$0 sm:$0xff] }
 0x25f   :  { %551 = vrsqrt.f32 %v320_v33  ;;  %vm327_vm8 = vweird.f32 %v320_v33 }
 0x265   :  { %v552_v35 = vpop.eup %551 }
 0x266   :  { %v322_v36 = vmul.f32 %v552_v35, %v320_v33  ;;  %vm328_vm7 = vweird.f32 %v552_v35 }
 0x267   :  { %vm329_vm9 = vmor %vm327_vm8, %vm328_vm7 }
 0x268   :  { %v323_v37 = vmul.f32 %v552_v35, %v322_v36 }
 0x26a   :  { %v324_v38 = vmul.f32 0.5, %v323_v37 }
 0x26c   :  { %v325_v39 = vsub.f32 1.5, %v324_v38 }
 0x26e   :  { %v326_v40 = vmul.f32 %v552_v35, %v325_v39 }
 0x270   :  { %v330_v42 = vsel %vm329_vm9, %v552_v35, %v326_v40 }
 0x271   :  { %v331_v44 = vmul.f32 %v330_v42, %v319_v41 }
 0x273   :  { %v332_v46 = vmul.f32 %v331_v44, %v101_v43 }
 0x275   :  { %v333_v47 = vadd.f32 %v332_v46, %v102_v45 }
 0x277   :  { %v529_v48 = vmul.f32 -1.442695, %v333_v47 }
 0x279   :  { %553 = vpow2.f32 %v529_v48  ;;  %v106_v48 = vld [vmem:[#allocation8 + $0x6] ss:$8 sm:$0x3] }
 0x27f   :  { %v554_v49 = vpop.eup %553 }
 0x280   :  { %v337_v50 = vadd.f32 1.0, %v554_v49  ;;  %v470_v49 = vperm.slane %v106_v48, 1 }
 0x282   :  { %555 = vrcp.f32 %v337_v50  ;;  %v349_v54 = vand.u32 2147483648, %v337_v50  ;;  %v347_v56 = vand.u32 2147483647, %v337_v50  ;;  %vm343_vm11 = vweird.f32 %v337_v50 }
 0x284   :  { %v350_v58 = vor.u32 1.1754944e-38, %v349_v54  ;;  %vm348_vm13 = vcmp.eq.f32.partialorder %v347_v56, 8.507059e+37 }
 0x288   :  { %v556_v51 = vpop.eup %555 }
 0x289   :  { %v339_v52 = vmul.f32 %v556_v51, %v337_v50  ;;  %vm344_vm10 = vweird.f32 %v556_v51 }
 0x28a   :  { %vm345_vm12 = vmor %vm343_vm11, %vm344_vm10 }
 0x28b   :  { %v340_v53 = vsub.f32 1.0, %v339_v52  ;;  %v469_v52 = vperm.slane %v106_v48, 0 }
 0x28d   :  { %v341_v55 = vmul.f32 %v556_v51, %v340_v53 }
 0x28f   :  { %v342_v57 = vadd.f32 %v556_v51, %v341_v55 }
 0x291   :  { %v346_v59 = vsel %vm345_vm12, %v556_v51, %v342_v57 }
 0x292   :  { %v351_v60 = vsel %vm348_vm13, %v350_v58, %v346_v59 }
 0x293   :  { %v353_v61 = vmul.f32 %v351_v60, %v333_v47 }
 0x295   :  { %530 = vmatmul.msk.f32.vlgmr.msrb.gmra.mxu2 %vm287_vm6, %v353_v61 }
 0x318   :  { %v382_v62 = vpop.f32.mrf.mxu2 }
 0x319   :  { %531 = vmatmul.msk.f32.vlgmr.msrb.gmra.mxu0 %vm287_vm6, %v382_v62  ;;  %v385_v63 = vmul.f32 %v382_v62, %v382_v62 }
 0x321   :  { %532 = vmatmul.msk.f32.gmra.mxu0 %vm287_vm6, %v385_v63 }
 0x396   :  { %v409_v0 = vpop.f32.mrf.mxu0 }
 0x397   :  { %v415_v1 = vmul.f32 %v409_v0, %v409_v0  ;;  %v417_v27 = vsub.f32 %v382_v62, %v409_v0 }
 0x39e   :  { %v412_v2 = vpop.f32.mrf.mxu0 }
 0x39f   :  { %v416_v3 = vsub.f32 %v412_v2, %v415_v1 }
 0x3a1   :  { %v418_v4 = vadd.f32 1e-05, %v416_v3 }
 0x3a3   :  { %557 = vrsqrt.f32 %v418_v4  ;;  %vm425_vm15 = vweird.f32 %v418_v4 }
 0x3a9   :  { %v558_v11 = vpop.eup %557 }
 0x3aa   :  { %v420_v12 = vmul.f32 %v558_v11, %v418_v4  ;;  %vm426_vm14 = vweird.f32 %v558_v11 }
 0x3ab   :  { %vm427_vm0 = vmor %vm425_vm15, %vm426_vm14 }
 0x3ac   :  { %v421_v15 = vmul.f32 %v558_v11, %v420_v12 }
 0x3ae   :  { %v422_v18 = vmul.f32 0.5, %v421_v15 }
 0x3b0   :  { %v423_v21 = vsub.f32 1.5, %v422_v18 }
 0x3b2   :  { %v424_v24 = vmul.f32 %v558_v11, %v423_v21 }
 0x3b4   :  { %v428_v29 = vsel %vm427_vm0, %v558_v11, %v424_v24 }
 0x3b5   :  { %v429_v30 = vmul.f32 %v428_v29, %v417_v27 }
 0x3b7   :  { %v430_v32 = vmul.f32 %v429_v30, %v103_v28 }
 0x3b9   :  { %v431_v33 = vadd.f32 %v430_v32, %v104_v31 }
 0x3bb   :  { %v533_v34 = vmul.f32 -1.442695, %v431_v33 }
 0x3bd   :  { %559 = vpow2.f32 %v533_v34 }
 0x3c3   :  { %v560_v35 = vpop.eup %559 }
 0x3c4   :  { %v435_v36 = vadd.f32 1.0, %v560_v35 }
 0x3c6   :  { %561 = vrcp.f32 %v435_v36  ;;  %v447_v40 = vand.u32 2147483648, %v435_v36  ;;  %v445_v42 = vand.u32 2147483647, %v435_v36  ;;  %vm441_vm2 = vweird.f32 %v435_v36 }
 0x3c8   :  { %v448_v44 = vor.u32 1.1754944e-38, %v447_v40  ;;  %vm446_vm4 = vcmp.eq.f32.partialorder %v445_v42, 8.507059e+37 }
 0x3cc   :  { %v562_v37 = vpop.eup %561 }
 0x3cd   :  { %v437_v38 = vmul.f32 %v562_v37, %v435_v36  ;;  %vm442_vm1 = vweird.f32 %v562_v37 }
 0x3ce   :  { %vm443_vm3 = vmor %vm441_vm2, %vm442_vm1 }
 0x3cf   :  { %v438_v39 = vsub.f32 1.0, %v437_v38 }
 0x3d1   :  { %v439_v41 = vmul.f32 %v562_v37, %v438_v39 }
 0x3d3   :  { %v440_v43 = vadd.f32 %v562_v37, %v439_v41 }
 0x3d5   :  { %v444_v45 = vsel %vm443_vm3, %v562_v37, %v440_v43 }
 0x3d6   :  { %v449_v46 = vsel %vm446_vm4, %v448_v44, %v444_v45 }
 0x3d7   :  { %v451_v47 = vmul.f32 %v449_v46, %v431_v33 }
 0x3d9   :  { %534 = vmatmul.msk.f32.vlgmr.msra.gmra.mxu2 %vm287_vm6, %v451_v47  ;;  %535 = vmatmul.msk.f32.vlgmr.msrb.gmra.mxu1 %vm287_vm6, %v451_v47 }
 0x456   :  { %v513_v50 = vpop.f32.mrf.mxu1 }
 0x457   :  { %v514_v51 = vadd.f32 %v513_v50, %v470_v49 }
 0x459   :  { %517 = vst [vmem:[%s929_s10 + $0x8] sm:$0xff] %v514_v51 }
 0x45c   :  { %v493_v53 = vpop.f32.mrf.mxu2 }
 0x45d   :  { %v494_v54 = vadd.f32 %v493_v53, %v469_v52 }
 0x45f   :  { %516 = vst [vmem:[%s929_s10] sm:$0xff] %v494_v54 }
 0x460   :  { %522 = vsyncpa [#allocation4], 1 }
 0x461   :  { %523 = vsyncpa [#allocation6], 1 }
 0x462   :  { %524 = vsyncpa [#allocation9], 1 }

</bundles_post_ra>
